<compile_context>
chip_gen: v6e
topology: v6e:2x2x1
jax: 0.10.0
libtpu: 0.0.40
codegen_flags: <defaults>
</compile_context>

<pallas_src>
import jax
import jax.numpy as jnp
from jax.experimental import pallas as pl
from jax.experimental.pallas import tpu as pltpu


# ---------------------------------------------------------------------------
# Helpers
# ---------------------------------------------------------------------------
_LANE = 128
_DEFAULT_TM = 1024
_DEFAULT_TILE = 256  # K/N tile for the tiled path (MXU-friendly on v6e/v7x)


def _round_up(x, m):
    return (x + m - 1) // m * m


def _pad_cols(a, cols):
    c = a.shape[-1]
    if c == cols:
        return a
    return jnp.pad(a, ((0, 0), (0, cols - c)))


def _pad2d(a, rows, cols):
    r, c = a.shape
    if r == rows and c == cols:
        return a
    return jnp.pad(a, ((0, rows - r), (0, cols - c)))


def _sublane(dtype):
    # Minimum row multiple for a packed layout: 8 (f32) / 16 (bf16) / 32 (i8).
    return max(8, 32 // jnp.dtype(dtype).itemsize)


def _compute_dtype(dtype, prefer_bf16):
    if prefer_bf16 and jnp.dtype(dtype) in (jnp.dtype(jnp.float32),
                                            jnp.dtype(jnp.bfloat16)):
        return jnp.bfloat16
    return dtype


def _choose_tm(m, tm_default, sublane, min_blocks=4):
    """Row-tile size: a multiple of `sublane` (or the full extent), capped at
    tm_default, giving >= min_blocks blocks when m allows so the 'parallel'
    M axis has work for both v7x TensorCores."""
    if m < min_blocks * sublane:
        return m  # single block spanning the full (possibly ragged) extent
    if m <= tm_default:
        return _round_up(-(-m // min_blocks), sublane)
    return tm_default


# ---------------------------------------------------------------------------
# Pallas kernels
# ---------------------------------------------------------------------------
def _fused_resident_kernel(x_ref, w_ref, b_ref, o_ref):
    # o = x @ W + b + x, W/bias VMEM-resident, residual added in f32 acc.
    x = x_ref[...]
    acc = jnp.dot(x, w_ref[...], preferred_element_type=jnp.float32)
    acc = acc + b_ref[...] + x.astype(jnp.float32)
    o_ref[...] = acc.astype(o_ref.dtype)


def _fused_tiled_kernel(x_ref, w_ref, b_ref, xres_ref, o_ref, acc_ref):
    # K/N-tiled o = x @ W + b + x with an f32 accumulator in VMEM scratch.
    k = pl.program_id(2)

    @pl.when(k == 0)
    def _():
        acc_ref[...] = jnp.zeros_like(acc_ref)

    acc_ref[...] += jnp.dot(x_ref[...], w_ref[...],
                            preferred_element_type=jnp.float32)

    @pl.when(k == pl.num_programs(2) - 1)
    def _():
        out = acc_ref[...] + b_ref[...] + xres_ref[...].astype(jnp.float32)
        o_ref[...] = out.astype(o_ref.dtype)


def _residual_add_kernel(y_ref, x_ref, o_ref):
    # Generic elementwise residual add: out = fn(x) + x.
    o_ref[...] = y_ref[...] + x_ref[...]


# ---------------------------------------------------------------------------
# Wrappers
# ---------------------------------------------------------------------------
def linear_residual(x, w, b, *, tm=_DEFAULT_TM, prefer_bf16=True,
                    force_tiled=False, max_resident_d=1024,
                    tile=_DEFAULT_TILE):
    """Fused Pallas kernel: x @ w + b + x (requires square w: D -> D)."""
    orig_shape = x.shape
    d = orig_shape[-1]
    assert w.shape == (d, d), "residual fusion requires d_in == d_out"
    assert b.shape == (d,)

    out_dtype = x.dtype
    cdt = _compute_dtype(x.dtype, prefer_bf16)
    sub = _sublane(cdt)

    x2 = x.reshape(-1, d).astype(cdt)
    wc = w.astype(cdt)
    m = x2.shape[0]

    use_tiled = force_tiled or _round_up(d, _LANE) > max_resident_d
    dp = _round_up(d, tile if use_tiled else _LANE)

    # Feature-dim pad only when needed; M is never padded (ragged last row
    # block is handled by Pallas with masked stores).
    x2 = _pad_cols(x2, dp)
    wc = _pad2d(wc, dp, dp)
    bp = jnp.pad(b.astype(jnp.float32), (0, dp - d)).reshape(1, dp)

    tm_ = _choose_tm(m, tm, sub)

    in_item = jnp.dtype(cdt).itemsize
    out_item = jnp.dtype(out_dtype).itemsize
    flops = 2 * m * dp * dp
    bytes_accessed = (m * dp * in_item          # x (lhs)
                      + dp * dp * in_item       # W
                      + dp * 4                  # bias
                      + m * dp * out_item)      # out
    if use_tiled:
        bytes_accessed += m * dp * in_item      # residual x blocks

    if not use_tiled:
        out = pl.pallas_call(
            _fused_resident_kernel,
            out_shape=jax.ShapeDtypeStruct((m, dp), out_dtype),
            grid=(pl.cdiv(m, tm_),),
            in_specs=[
                pl.BlockSpec((tm_, dp), lambda i: (i, 0)),   # x row block
                pl.BlockSpec((dp, dp), lambda i: (0, 0)),    # W resident
                pl.BlockSpec((1, dp), lambda i: (0, 0)),     # bias resident
            ],
            out_specs=pl.BlockSpec((tm_, dp), lambda i: (i, 0)),
            compiler_params=pltpu.CompilerParams(
                dimension_semantics=("parallel",)),
            cost_estimate=pl.CostEstimate(flops=flops, transcendentals=0,
                                          bytes_accessed=bytes_accessed),
        )(x2, wc, bp)
    else:
        tk = tn = tile
        grid = (pl.cdiv(m, tm_), dp // tn, dp // tk)
        out = pl.pallas_call(
            _fused_tiled_kernel,
            out_shape=jax.ShapeDtypeStruct((m, dp), out_dtype),
            grid=grid,
            in_specs=[
                pl.BlockSpec((tm_, tk), lambda i, j, k: (i, k)),  # lhs
                pl.BlockSpec((tk, tn), lambda i, j, k: (k, j)),   # W tile
                pl.BlockSpec((1, tn), lambda i, j, k: (0, j)),    # bias
                pl.BlockSpec((tm_, tn), lambda i, j, k: (i, j)),  # residual x
            ],
            out_specs=pl.BlockSpec((tm_, tn), lambda i, j, k: (i, j)),
            scratch_shapes=[pltpu.VMEM((tm_, tn), jnp.float32)],
            compiler_params=pltpu.CompilerParams(
                dimension_semantics=("parallel", "parallel", "arbitrary")),
            cost_estimate=pl.CostEstimate(flops=flops, transcendentals=0,
                                          bytes_accessed=bytes_accessed),
        )(x2, wc, bp, x2)

    if dp != d:
        out = out[:, :d]
    return out.reshape(orig_shape)


def residual_add(y, x, *, tm=_DEFAULT_TM):
    """Generic Pallas residual add: y + x (fallback for arbitrary fn)."""
    assert y.shape == x.shape and y.dtype == x.dtype
    orig_shape = x.shape
    total = x.size
    sub = _sublane(x.dtype)

    if total % _LANE == 0:
        # Lane-dense flatten: unmasked full-width stores, zero extra copies.
        d = _LANE
    else:
        d = orig_shape[-1]  # full-extent last dim (masked stores, no copies)
    x2 = x.reshape(-1, d)
    y2 = y.reshape(-1, d)
    m = x2.shape[0]

    tm_ = _choose_tm(m, tm, sub)
    itemsize = jnp.dtype(x.dtype).itemsize

    out = pl.pallas_call(
        _residual_add_kernel,
        out_shape=jax.ShapeDtypeStruct((m, d), x.dtype),
        grid=(pl.cdiv(m, tm_),),
        in_specs=[
            pl.BlockSpec((tm_, d), lambda i: (i, 0)),
            pl.BlockSpec((tm_, d), lambda i: (i, 0)),
        ],
        out_specs=pl.BlockSpec((tm_, d), lambda i: (i, 0)),
        input_output_aliases={0: 0},  # let XLA reuse fn(x)'s buffer if dead
        compiler_params=pltpu.CompilerParams(
            dimension_semantics=("parallel",)),
        cost_estimate=pl.CostEstimate(flops=total, transcendentals=0,
                                      bytes_accessed=3 * total * itemsize),
    )(y2, x2)
    return out.reshape(orig_shape)


# ---------------------------------------------------------------------------
# Module ports
# ---------------------------------------------------------------------------
class PallasLinear:
    """Deterministic Linear D -> D used as the wrapped fn in the demo."""

    def __init__(self, w, b):
        self.w = w
        self.b = b

    def __call__(self, x):
        # Plain path (only used by the generic residual fallback).
        return (jnp.dot(x, self.w) + self.b).astype(x.dtype)

    def fused_residual(self, x):
        # Single fused pallas_call: matmul + bias + residual add.
        return linear_residual(x, self.w, self.b)


class Residual:
    """JAX/Pallas port of vit_pytorch.linformer.Residual: fn(x) + x."""

    def __init__(self, fn):
        self.fn = fn

    def __call__(self, x, **kwargs):
        fused = getattr(self.fn, "fused_residual", None)
        if fused is not None and not kwargs:
            return fused(x)  # single fused kernel on the hot path
        return residual_add(self.fn(x, **kwargs), x)


# ---------------------------------------------------------------------------
# Demo
# ---------------------------------------------------------------------------
if __name__ == "__main__":
    key = jax.random.PRNGKey(0)
    kx, kw, kb, kx2, kw2, kb2 = jax.random.split(key, 6)

    # --- small demo shape (resident-W fused path + generic fallback) -------
    B, N, D = 2, 8, 32
    x = jax.random.normal(kx, (B, N, D), dtype=jnp.float32)
    w = jax.random.normal(kw, (D, D), dtype=jnp.float32) / jnp.sqrt(D)
    b = jax.random.normal(kb, (D,), dtype=jnp.float32) * 0.01

    # Reference computed with the same bf16 operand rounding the kernel uses.
    xb = x.astype(jnp.bfloat16).astype(jnp.float32)
    wb = w.astype(jnp.bfloat16).astype(jnp.float32)
    ref_fused = jnp.dot(xb, wb) + b + xb

    residual_fused = Residual(PallasLinear(w, b))
    out_fused = jax.block_until_ready(residual_fused(x))
    assert out_fused.shape == x.shape
    assert jnp.allclose(out_fused, ref_fused, atol=1e-3, rtol=1e-3), \
        "fused (resident) mismatch"

    # Generic fallback (arbitrary fn -> separate residual_add kernel, f32).
    ref_generic = jnp.dot(x, w) + b + x
    residual_generic = Residual(lambda t: (jnp.dot(t, w) + b).astype(t.dtype))
    out_generic = jax.block_until_ready(residual_generic(x))
    assert jnp.allclose(out_generic, ref_generic, atol=1e-5, rtol=1e-5), \
        "generic mismatch"

    # --- K/N-tiled accumulator path (large-D route, forced here) -----------
    M2, D2 = 256, 512
    x2_ = jax.random.normal(kx2, (M2, D2), dtype=jnp.float32)
    w2 = jax.random.normal(kw2, (D2, D2), dtype=jnp.float32) / jnp.sqrt(D2)
    b2 = jax.random.normal(kb2, (D2,), dtype=jnp.float32) * 0.01

    xb2 = x2_.astype(jnp.bfloat16).astype(jnp.float32)
    wb2 = w2.astype(jnp.bfloat16).astype(jnp.float32)
    ref2 = jnp.dot(xb2, wb2) + b2 + xb2

    out_resident = jax.block_until_ready(linear_residual(x2_, w2, b2))
    out_tiled = jax.block_until_ready(
        linear_residual(x2_, w2, b2, force_tiled=True))
    assert jnp.allclose(out_resident, ref2, atol=1e-2, rtol=1e-2), \
        "resident-W path mismatch (D=512)"
    assert jnp.allclose(out_tiled, ref2, atol=1e-2, rtol=1e-2), \
        "tiled K/N path mismatch (D=512)"

    print("KERNEL_OK")
</pallas_src>

<mosaic_0001>
module attributes {stable_mosaic.version = 11 : i64} {
  func.func @_fused_resident_kernel(%arg0: i32, %arg1: memref<16x128xbf16, #tpu.memory_space<vmem>>, %arg2: memref<128x128xbf16, #tpu.memory_space<vmem>>, %arg3: memref<1x128xf32, #tpu.memory_space<vmem>>, %arg4: memref<16x128xf32, #tpu.memory_space<vmem>>) attributes {dimension_semantics = [#tpu.dimension_semantics<parallel>], iteration_bounds = array<i64: 1>, scalar_prefetch = 0 : i64, scratch_operands = 0 : i64, tpu.core_type = #tpu.core_type<tc>, window_params = [{transform_indices = @transform_0, window_bounds = array<i64: 16, 128>}, {pipeline_mode = #tpu.pipeline_mode<synchronous>, transform_indices = @transform_1, window_bounds = array<i64: 128, 128>}, {pipeline_mode = #tpu.pipeline_mode<synchronous>, transform_indices = @transform_2, window_bounds = array<i64: 1, 128>}, {transform_indices = @transform_3, window_bounds = array<i64: 16, 128>}]} {
    %c0 = arith.constant 0 : index
    %c0_0 = arith.constant 0 : index
    %0 = vector.load %arg1[%c0, %c0_0] : memref<16x128xbf16, #tpu.memory_space<vmem>>, vector<16x128xbf16>
    %c0_1 = arith.constant 0 : index
    %c0_2 = arith.constant 0 : index
    %1 = vector.load %arg2[%c0_1, %c0_2] : memref<128x128xbf16, #tpu.memory_space<vmem>>, vector<128x128xbf16>
    %cst = arith.constant dense<0.000000e+00> : vector<16x128xf32>
    %2 = tpu.matmul %0, %1, %cst {dimension_numbers = #tpu.dot_dimension_numbers<[1], [0], [0], [1], [0, 0, 1, 1], [], []>} : vector<16x128xbf16>, vector<128x128xbf16>, vector<16x128xf32> -> vector<16x128xf32>
    %c0_3 = arith.constant 0 : index
    %c0_4 = arith.constant 0 : index
    %3 = vector.load %arg3[%c0_3, %c0_4] : memref<1x128xf32, #tpu.memory_space<vmem>>, vector<1x128xf32>
    %4 = vector.broadcast %3 : vector<1x128xf32> to vector<16x128xf32>
    %5 = arith.addf %2, %4 : vector<16x128xf32>
    %6 = arith.extf %0 : vector<16x128xbf16> to vector<16x128xf32>
    %7 = arith.addf %5, %6 : vector<16x128xf32>
    %c0_5 = arith.constant 0 : index
    %c0_6 = arith.constant 0 : index
    %8 = vector.load %arg4[%c0_5, %c0_6] : memref<16x128xf32, #tpu.memory_space<vmem>>, vector<16x128xf32>
    tpu.vector_store %arg4[%c0_5, %c0_6], %7 {strides = array<i32>} : memref<16x128xf32, #tpu.memory_space<vmem>>, vector<16x128xf32>,
    return
  }
  func.func @transform_0(%arg0: i32) -> (i32, i32) {
    %c0_i32 = arith.constant 0 : i32
    %c0_i32_0 = arith.constant 0 : i32
    return %arg0, %c0_i32 : i32, i32
  }
  func.func @transform_1(%arg0: i32) -> (i32, i32) {
    %c0_i32 = arith.constant 0 : i32
    %c0_i32_0 = arith.constant 0 : i32
    %c0_i32_1 = arith.constant 0 : i32
    return %c0_i32, %c0_i32_0 : i32, i32
  }
  func.func @transform_2(%arg0: i32) -> (i32, i32) {
    %c0_i32 = arith.constant 0 : i32
    %c0_i32_0 = arith.constant 0 : i32
    %c0_i32_1 = arith.constant 0 : i32
    return %c0_i32, %c0_i32_0 : i32, i32
  }
  func.func @transform_3(%arg0: i32) -> (i32, i32) {
    %c0_i32 = arith.constant 0 : i32
    %c0_i32_0 = arith.constant 0 : i32
    return %arg0, %c0_i32 : i32, i32
  }
}

</mosaic_0001>

<bundles_post_ra>
// kernel: tpu_custom_call.1
= control target key start
LH: loop header
LB: loop body
LE: loop exit
PB: predicated region body
PF: predicated region fallthrough
CT: control target
= control target key end

     0   :  { %8 = vsyncpa [#allocation3], 0  ;;  %s353_s0 = inlined_call_operand.hbm [shape: bf16[16,128], index: 0, kind: input, shape index: {}]   ;;  %s354_s1 = inlined_call_operand.hbm [shape: bf16[128,128], index: 1, kind: input, shape index: {}]   ;;  %s355_s2 = inlined_call_operand.vmem [shape: f32[1,128], index: 2, kind: input, shape index: {}]   ;;  %s356_s3 = inlined_call_operand.hbm [shape: f32[16,128], index: 3, kind: output, shape index: {}]  }
   0x1   :  { %9 = vsyncpa [#allocation6], 0 }
   0x2   :  { %10 = vsyncpa [#allocation4], 0  ;;  %s312_s12 = smov [#allocation2]  }
   0x3   :  { %s16_s13 = sshll.u32 %s312_s12, 4  ;;  %s17_s13 = int_to_ptr.vmem [resolvable:$true] %s16_s13 }
   0x4   :  { %s254_s14 = scalar_lea.vmem %s17_s13, 128  ;;  %p259_p1 = scmp.lt.s32.totalorder %s17_s13, %s17_s13 }
   0x5   :  { %p255_p0 = scmp.ne.s32.totalorder %s17_s13, %s254_s14  ;;  %p260_p2 = scmp.lt.s32.totalorder %s254_s14, %s254_s14 }
   0x7   :  { %p261_p3 = por %p260_p2, %p259_p1 }
   0x9   :  { %p262_p4 = pnand %p261_p3, %p255_p0 }
   0xb   :  { %265 = shalt.err (!%p262_p4)
}
   0xc   :  { %s313_s15 = smov 64   ;;  %s314_s16 = smov 4  }
   0xd   :  { %22 = dma.hbm_to_vmem [thread:$0]  %s353_s0, 128, %s17_s13, [#allocation3], %s313_s15, %s313_s15, %s314_s16  }
   0xe   :  { %s315_s19 = smov [#allocation5]  }
   0xf   :  { %s28_s20 = sshll.u32 %s315_s19, 4  ;;  %s29_s20 = int_to_ptr.vmem [resolvable:$true] %s28_s20 }
  0x10   :  { %s274_s21 = scalar_lea.vmem %s29_s20, 1024  ;;  %p279_p6 = scmp.lt.s32.totalorder %s29_s20, %s29_s20 }
  0x11   :  { %p275_p5 = scmp.ne.s32.totalorder %s29_s20, %s274_s21  ;;  %p280_p7 = scmp.lt.s32.totalorder %s274_s21, %s274_s21 }
  0x13   :  { %p281_p8 = por %p280_p7, %p279_p6 }
  0x15   :  { %p282_p9 = pnand %p281_p8, %p275_p5 }
  0x17   :  { %285 = shalt.err (!%p282_p9)
}
  0x18   :  { %34 = dma.hbm_to_vmem [thread:$0]  %s354_s1, 1024, %s29_s20, [#allocation6], %s313_s15, %s313_s15, %s314_s16  }
  0x19   :  { %306 = dma.done.wait [#allocation3], 128  }
  0x1a   :  { %307 = vsyncadd [#allocation3], 4294967168 }
  0x1b   :  { %308 = dma.done.wait [#allocation6], 1024  }
  0x1c   :  { %309 = vsyncadd [#allocation6], 4294966272  ;;  %v316_v0 = vmov 0.0   ;;  %vm317_vm0 = vmmov 0   ;;  %v236_v1 = vld [vmem:[#allocation5 + $0x38] sm:$0xff]   ;;  %v237_v2 = vld [vmem:[#allocation5 + $0x30] sm:$0xff]  }
  0x1d   :  { %207 = vmatprep.subr.bf16.mxu0 %v316_v0  ;;  %223 = vmatprep.mubr.msk.bf16.mxu0 %vm317_vm0, %v316_v0  ;;  %v238_v3 = vld [vmem:[#allocation5 + $0x28] sm:$0xff]   ;;  %v239_v4 = vld [vmem:[#allocation5 + $0x20] sm:$0xff]   ;;  %v240_v5 = vld [vmem:[#allocation5 + $0x18] sm:$0xff]   ;;  %s318_s24 = smov [#allocation7]  }
  0x1e   :  { %208 = vmatpush3.bf16.msra.mxu0 %v236_v1  ;;  %v241_v6 = vld [vmem:[#allocation5 + $0x10] sm:$0xff]   ;;  %v242_v7 = vld [vmem:[#allocation5 + $0x8] sm:$0xff]   ;;  %v243_v8 = vld [vmem:[#allocation5] sm:$0xff]   ;;  %s175_s25 = sshll.u32 %s318_s24, 4  ;;  %s176_s25 = int_to_ptr.vmem [resolvable:$true] %s175_s25 }
  0x1f   :  { %209 = vmatprep.subr.bf16.mxu0 %v316_v0  ;;  %v44_v9 = vld [vmem:[#allocation2] sm:$0xff]   ;;  %s286_s26 = scalar_lea.vmem %s176_s25, 256  ;;  %p291_p11 = scmp.lt.s32.totalorder %s176_s25, %s176_s25 }
  0x20   :  { %v188_v10 = vld [vmem:[%s355_s2] ss:$0 sm:$0xff]  ;;  %v164_v11 = vunpack.c.l.bf16 %v44_v9  ;;  %v165_v16 = vunpack.c.h.bf16 %v44_v9  ;;  %p287_p10 = scmp.ne.s32.totalorder %s176_s25, %s286_s26  ;;  %p292_p12 = scmp.lt.s32.totalorder %s286_s26, %s286_s26 }
  0x22   :  { %210 = vmatpush3.bf16.msra.mxu0 %v237_v2  ;;  %p293_p13 = por %p292_p12, %p291_p11 }
  0x23   :  { %211 = vmatprep.subr.bf16.mxu0 %v316_v0 }
  0x24   :  { %p294_p0 = pnand %p293_p13, %p287_p10 }
  0x26   :  { %212 = vmatpush3.bf16.msra.mxu0 %v238_v3 }
  0x27   :  { %213 = vmatprep.subr.bf16.mxu0 %v316_v0 }
  0x2a   :  { %214 = vmatpush3.bf16.msra.mxu0 %v239_v4 }
  0x2b   :  { %215 = vmatprep.subr.bf16.mxu0 %v316_v0 }
  0x2e   :  { %216 = vmatpush3.bf16.msra.mxu0 %v240_v5 }
  0x2f   :  { %217 = vmatprep.subr.bf16.mxu0 %v316_v0 }
  0x32   :  { %218 = vmatpush3.bf16.msra.mxu0 %v241_v6 }
  0x33   :  { %219 = vmatprep.subr.bf16.mxu0 %v316_v0 }
  0x36   :  { %220 = vmatpush3.bf16.msra.mxu0 %v242_v7 }
  0x37   :  { %221 = vmatprep.subr.bf16.mxu0 %v316_v0 }
  0x3a   :  { %222 = vmatpush3.bf16.msra.mxu0 %v243_v8 }
  0x3d   :  { %224 = vmatmul.mubr.bf16.vlgmr.msra.gmra.mxu0 %v44_v9 }
  0xfd   :  { %v157_v12 = vpop.f32.mrf.mxu0 }
  0xfe   :  { %v158_v13 = vadd.f32 %v188_v10, %v157_v12 }
  0xff   :  { %v225_v14 = vpop.f32.mrf.mxu0 }
 0x100   :  { %v166_v15 = vadd.f32 %v164_v11, %v158_v13 }
 0x101   :  { %v160_v17 = vpop.f32.mrf.mxu0 }
 0x102   :  { %168 = vst [vmem:[#allocation7] sm:$0xff] %v166_v15  ;;  %v161_v18 = vadd.f32 %v188_v10, %v160_v17 }
 0x103   :  { %v226_v19 = vpop.f32.mrf.mxu0 }
 0x104   :  { %v167_v20 = vadd.f32 %v165_v16, %v161_v18 }
 0x106   :  { %169 = vst [vmem:[#allocation7 + $0x8] sm:$0xff] %v167_v20 }
 0x107   :  { %297 = shalt.err (!%p294_p0)
}
 0x108   :  { %s319_s2 = smov 128   ;;  %s320_s27 = smov 8  }
 0x109   :  { %181 = dma.vmem_to_hbm [thread:$0]  %s176_s25, 256, %s356_s3, [#allocation4], %s319_s2, %s319_s2, %s320_s27  }
 0x10a   :  { %310 = dma.done.wait [#allocation4], 256  }
 0x10b   :  { %311 = vsyncadd [#allocation4], 4294967040 }
 0x10c   :  { %185 = vsyncpa [#allocation3], 1 }
 0x10d   :  { %186 = vsyncpa [#allocation6], 1 }
 0x10e   :  { %187 = vsyncpa [#allocation4], 1 }

</bundles_post_ra>
